<compile_context>
chip_gen: v6e
topology: v6e:2x2x1
jax: 0.10.0
libtpu: 0.0.40
codegen_flags: <defaults>
</compile_context>

<pallas_src>
import jax
import jax.numpy as jnp
from jax.experimental import pallas as pl
from jax.experimental.pallas import tpu as pltpu


def _round_up(n, m):
    return ((n + m - 1) // m) * m


def _nn_kernel(x_ref, params_ref, out_ref):
    """x_ref: (TB, in_dim) f32; params_ref: (rows, mid_pad) f32; out_ref: (TB, 1) i32.

    Slab layout (built once at init, outside the hot path):
      rows [0 : in_dim]   -> w1ᵀ  (in_dim, mid_pad), pre-transposed, zero-padded
      row  in_dim         -> b1   (padded lanes 0, except lane `mid_dim` = 1.0)
      row  in_dim + 1     -> w2   (padded lanes 0, except lane `mid_dim` = b2)
      remaining rows      -> zero padding (sublane alignment only)
    """
    in_dim = x_ref.shape[1]

    # Layer 1 on the MXU: (TB, in) @ (in, mid_pad) -> (TB, mid_pad), lane-dense.
    h = jnp.dot(
        x_ref[...],
        params_ref[0:in_dim, :],
        preferred_element_type=jnp.float32,
    )
    h = h + params_ref[in_dim:in_dim + 1, :]            # + b1 (row broadcast)

    # Fused sign-threshold + layer 2:  sign(h) * w2  summed over lanes.
    # h <= 0 -> -w2 (matches x[x<=0] = -1), h > 0 -> +w2.  The bias lane always
    # has h = 1 > 0 and w2 = b2, so the reduce already includes the output bias.
    w2 = params_ref[in_dim + 1:in_dim + 2, :]           # (1, mid_pad)
    y = jnp.sum(jnp.where(h > 0.0, w2, -w2), axis=1, keepdims=True)  # (TB, 1)

    # `1 if int(y) > 0 else -1`; int() truncates toward zero, so
    # trunc(y) > 0  <=>  y >= 1.0 (and is immune to int overflow).
    out_ref[...] = jnp.where(y >= 1.0, 1, -1).astype(jnp.int32)


def neural_network_forward(x, params, *, tile_b=128):
    """Batched forward pass.

    x      : (B, in_dim)       float32
    params : (rows, mid_pad)   float32 packed slab from `pack_params`
    returns: (B,) int32 vector of +1 / -1 decisions.
    """
    B, in_dim = x.shape
    rows, mid_pad = params.shape

    tb = min(tile_b, _round_up(B, 8))        # batch tile, multiple of 8
    b_pad = _round_up(B, tb)
    if b_pad != B:
        x = jnp.pad(x, ((0, b_pad - B), (0, 0)))

    out = pl.pallas_call(
        _nn_kernel,
        out_shape=jax.ShapeDtypeStruct((b_pad, 1), jnp.int32),
        grid=(b_pad // tb,),
        in_specs=[
            # x: tiled over the batch axis.
            pl.BlockSpec((tb, in_dim), lambda i: (i, 0)),
            # Parameter slab: constant index_map -> DMA'd once, VMEM-resident.
            pl.BlockSpec((rows, mid_pad), lambda i: (0, 0)),
        ],
        out_specs=pl.BlockSpec((tb, 1), lambda i: (i, 0)),
        compiler_params=pltpu.CompilerParams(
            dimension_semantics=("parallel",),
        ),
    )(x, params)
    return out[:B, 0]


def init_params(key, in_dim, mid_dim, out_dim=1):
    """torch.nn.Linear-style uniform(-1/sqrt(fan_in), +1/sqrt(fan_in)) init,
    in the original PyTorch layouts (packing happens separately)."""
    k1, k2, k3, k4 = jax.random.split(key, 4)
    bound1 = 1.0 / jnp.sqrt(jnp.float32(in_dim))
    bound2 = 1.0 / jnp.sqrt(jnp.float32(mid_dim))
    w1 = jax.random.uniform(k1, (mid_dim, in_dim), jnp.float32, -bound1, bound1)
    b1 = jax.random.uniform(k2, (mid_dim,), jnp.float32, -bound1, bound1)
    w2 = jax.random.uniform(k3, (out_dim, mid_dim), jnp.float32, -bound2, bound2)
    b2 = jax.random.uniform(k4, (out_dim,), jnp.float32, -bound2, bound2)
    return w1, b1, w2, b2


def pack_params(w1, b1, w2, b2):
    """Pack (w1ᵀ, b1, w2, b2) into one kernel-ready f32 slab (one-time cost).

    w1: (mid, in)  b1: (mid,)  w2: (1, mid)  b2: (1,)   — PyTorch layouts.
    Returns slab of shape (round_up(in+2, 8), round_up(mid+1, 128)).
    """
    mid_dim, in_dim = w1.shape
    mid_pad = _round_up(mid_dim + 1, 128)     # >= 1 spare lane for the b2 fold
    rows = _round_up(in_dim + 2, 8)

    slab = jnp.zeros((rows, mid_pad), jnp.float32)
    slab = slab.at[:in_dim, :mid_dim].set(w1.T.astype(jnp.float32))
    slab = slab.at[in_dim, :mid_dim].set(b1.astype(jnp.float32))
    slab = slab.at[in_dim, mid_dim].set(1.0)                       # h > 0 always
    slab = slab.at[in_dim + 1, :mid_dim].set(w2.reshape(-1).astype(jnp.float32))
    slab = slab.at[in_dim + 1, mid_dim].set(jnp.asarray(b2).reshape(-1)[0])
    return slab


if __name__ == "__main__":
    in_dim, mid_dim, out_dim = 32, 64, 1
    batch = 8

    key = jax.random.PRNGKey(0)
    kx, kp = jax.random.split(key)
    x = jax.random.normal(kx, (batch, in_dim), jnp.float32)
    w1, b1, w2, b2 = init_params(kp, in_dim, mid_dim, out_dim)
    params = pack_params(w1, b1, w2, b2)

    out = neural_network_forward(x, params)
    out = jax.block_until_ready(out)

    # Pure-JAX reference with the original PyTorch semantics.
    h = x @ w1.T + b1[None, :]                  # (B, mid)
    h = jnp.where(h > 0.0, 1.0, -1.0)           # x[x<=0]=-1 ; x[x>0]=1
    y = h @ w2.T + b2[None, :]                  # (B, 1)
    ref = jnp.where(jnp.trunc(y[:, 0]) > 0, 1, -1).astype(jnp.int32)
    assert jnp.array_equal(out, ref), (out, ref)

    # Module-faithful single-sample usage: Python-int decision outside kernel.
    single = 1 if int(neural_network_forward(x[:1], params)[0]) > 0 else -1
    assert single == int(ref[0]), (single, int(ref[0]))

    print("KERNEL_OK")
</pallas_src>

<mosaic_0001>
module attributes {stable_mosaic.version = 11 : i64} {
  func.func @_nn_kernel(%arg0: i32, %arg1: memref<8x32xf32, #tpu.memory_space<vmem>>, %arg2: memref<40x128xf32, #tpu.memory_space<vmem>>, %arg3: memref<8x1xi32, #tpu.memory_space<vmem>>) attributes {dimension_semantics = [#tpu.dimension_semantics<parallel>], iteration_bounds = array<i64: 1>, scalar_prefetch = 0 : i64, scratch_operands = 0 : i64, tpu.core_type = #tpu.core_type<tc>, window_params = [{transform_indices = @transform_0, window_bounds = array<i64: 8, 32>}, {pipeline_mode = #tpu.pipeline_mode<synchronous>, transform_indices = @transform_1, window_bounds = array<i64: 40, 128>}, {transform_indices = @transform_2, window_bounds = array<i64: 8, 1>}]} {
    %c0 = arith.constant 0 : index
    %c0_0 = arith.constant 0 : index
    %0 = vector.load %arg1[%c0, %c0_0] : memref<8x32xf32, #tpu.memory_space<vmem>>, vector<8x32xf32>
    %c0_1 = arith.constant 0 : index
    %c0_2 = arith.constant 0 : index
    %1 = vector.load %arg2[%c0_1, %c0_2] : memref<40x128xf32, #tpu.memory_space<vmem>>, vector<32x128xf32>
    %cst = arith.constant dense<0.000000e+00> : vector<8x128xf32>
    %2 = tpu.matmul %0, %1, %cst {dimension_numbers = #tpu.dot_dimension_numbers<[1], [0], [0], [1], [0, 0, 1, 1], [], []>} : vector<8x32xf32>, vector<32x128xf32>, vector<8x128xf32> -> vector<8x128xf32>
    %c32 = arith.constant 32 : index
    %c0_3 = arith.constant 0 : index
    %3 = vector.load %arg2[%c32, %c0_3] : memref<40x128xf32, #tpu.memory_space<vmem>>, vector<1x128xf32>
    %4 = vector.broadcast %3 : vector<1x128xf32> to vector<8x128xf32>
    %5 = arith.addf %2, %4 : vector<8x128xf32>
    %c33 = arith.constant 33 : index
    %c0_4 = arith.constant 0 : index
    %6 = vector.load %arg2[%c33, %c0_4] : memref<40x128xf32, #tpu.memory_space<vmem>>, vector<1x128xf32>
    %cst_5 = arith.constant 0.000000e+00 : f32
    %7 = vector.broadcast %cst_5 : f32 to vector<8x128xf32>
    %8 = arith.cmpf ogt, %5, %7 : vector<8x128xf32>
    %cst_6 = arith.constant 0.000000e+00 : f32
    %9 = vector.broadcast %cst_6 : f32 to vector<1x128xf32>
    %10 = arith.subf %9, %6 : vector<1x128xf32>
    %11 = vector.shape_cast %6 : vector<1x128xf32> to vector<1x128xf32>
    %12 = vector.broadcast %11 : vector<1x128xf32> to vector<8x128xf32>
    %13 = vector.shape_cast %10 : vector<1x128xf32> to vector<1x128xf32>
    %14 = vector.broadcast %13 : vector<1x128xf32> to vector<8x128xf32>
    %15 = arith.select %8, %12, %14 : vector<8x128xi1>, vector<8x128xf32>
    %cst_7 = arith.constant dense<0.000000e+00> : vector<8xf32>
    %16 = vector.multi_reduction <add>, %15, %cst_7 [1] : vector<8x128xf32> to vector<8xf32>
    %17 = vector.shape_cast %16 : vector<8xf32> to vector<8x1xf32>
    %cst_8 = arith.constant 1.000000e+00 : f32
    %18 = vector.broadcast %cst_8 : f32 to vector<8x1xf32>
    %19 = arith.cmpf oge, %17, %18 : vector<8x1xf32>
    %c1_i32 = arith.constant 1 : i32
    %c-1_i32 = arith.constant -1 : i32
    %20 = vector.broadcast %c1_i32 : i32 to vector<8x1xi32>
    %21 = vector.broadcast %c-1_i32 : i32 to vector<8x1xi32>
    %22 = arith.select %19, %20, %21 : vector<8x1xi1>, vector<8x1xi32>
    %c0_9 = arith.constant 0 : index
    %c0_10 = arith.constant 0 : index
    %23 = vector.load %arg3[%c0_9, %c0_10] : memref<8x1xi32, #tpu.memory_space<vmem>>, vector<8x1xi32>
    tpu.vector_store %arg3[%c0_9, %c0_10], %22 {strides = array<i32>} : memref<8x1xi32, #tpu.memory_space<vmem>>, vector<8x1xi32>,
    return
  }
  func.func @transform_0(%arg0: i32) -> (i32, i32) {
    %c0_i32 = arith.constant 0 : i32
    %c0_i32_0 = arith.constant 0 : i32
    return %arg0, %c0_i32 : i32, i32
  }
  func.func @transform_1(%arg0: i32) -> (i32, i32) {
    %c0_i32 = arith.constant 0 : i32
    %c0_i32_0 = arith.constant 0 : i32
    %c0_i32_1 = arith.constant 0 : i32
    return %c0_i32, %c0_i32_0 : i32, i32
  }
  func.func @transform_2(%arg0: i32) -> (i32, i32) {
    %c0_i32 = arith.constant 0 : i32
    %c0_i32_0 = arith.constant 0 : i32
    return %arg0, %c0_i32 : i32, i32
  }
}

</mosaic_0001>

<bundles_post_ra>
// kernel: tpu_custom_call.1
= control target key start
LH: loop header
LB: loop body
LE: loop exit
PB: predicated region body
PF: predicated region fallthrough
CT: control target
= control target key end

     0   :  { %7 = vsyncpa [#allocation3], 0  ;;  %s245_s0 = inlined_call_operand.hbm [shape: f32[8,32], index: 0, kind: input, shape index: {}]   ;;  %s246_s1 = inlined_call_operand.hbm [shape: f32[40,128], index: 1, kind: input, shape index: {}]   ;;  %s247_s2 = inlined_call_operand.vmem [shape: s32[8,1], index: 2, kind: output, shape index: {}]  }
   0x1   :  { %8 = vsyncpa [#allocation5], 0  ;;  %s214_s9 = smov [#allocation2]   ;;  %s215_s11 = smov [#allocation4]  }
   0x2   :  { %s15_s10 = sshll.u32 %s214_s9, 4  ;;  %s24_s12 = sshll.u32 %s215_s11, 4  ;;  %s16_s10 = int_to_ptr.vmem [resolvable:$true] %s15_s10  ;;  %s25_s12 = int_to_ptr.vmem [resolvable:$true] %s24_s12 }
   0x3   :  { %s178_s13 = scalar_lea.vmem %s16_s10, 128  ;;  %p183_p1 = scmp.lt.s32.totalorder %s16_s10, %s16_s10 }
   0x4   :  { %p179_p0 = scmp.ne.s32.totalorder %s16_s10, %s178_s13  ;;  %p184_p2 = scmp.lt.s32.totalorder %s178_s13, %s178_s13 }
   0x6   :  { %p185_p3 = por %p184_p2, %p183_p1 }
   0x8   :  { %p186_p4 = pnand %p185_p3, %p179_p0 }
   0xa   :  { %189 = shalt.err (!%p186_p4)
}
   0xb   :  { %18 = dma.hbm_to_vmem [thread:$0]  %s245_s0, 128, %s16_s10, [#allocation3]  }
   0xc   :  { %s198_s16 = scalar_lea.vmem %s25_s12, 640  ;;  %p203_p6 = scmp.lt.s32.totalorder %s25_s12, %s25_s12 }
   0xd   :  { %p199_p5 = scmp.ne.s32.totalorder %s25_s12, %s198_s16  ;;  %p204_p7 = scmp.lt.s32.totalorder %s198_s16, %s198_s16 }
   0xf   :  { %p205_p8 = por %p204_p7, %p203_p6 }
  0x11   :  { %p206_p9 = pnand %p205_p8, %p199_p5 }
  0x13   :  { %209 = shalt.err (!%p206_p9)
}
  0x14   :  { %s216_s17 = smov 128   ;;  %s217_s18 = smov 8  }
  0x15   :  { %30 = dma.hbm_to_vmem [thread:$0]  %s246_s1, 640, %s25_s12, [#allocation5], %s216_s17, %s216_s17, %s217_s18  }
  0x16   :  { %210 = dma.done.wait [#allocation3], 128  }
  0x17   :  { %211 = vsyncadd [#allocation3], 4294967168 }
  0x18   :  { %212 = dma.done.wait [#allocation5], 640  }
  0x19   :  { %213 = vsyncadd [#allocation5], 4294966656  ;;  %v218_v0 = vmov 0.0   ;;  %vm219_vm0 = vmmov 0   ;;  %v41_v1 = vld [vmem:[#allocation4 + $0x18] sm:$0xff]  ;;  %v40_v2 = vld [vmem:[#allocation4 + $0x10] sm:$0xff]  ;;  %v124_v6 = vlaneseq }
  0x1a   :  { %152 = vmatprep.subr.mxu0 %v218_v0  ;;  %160 = vmatprep.mubr.msk.f32.mxu0 %vm219_vm0, %v218_v0  ;;  %v39_v3 = vld [vmem:[#allocation4 + $0x8] sm:$0xff]  ;;  %v38_v4 = vld [vmem:[#allocation4] sm:$0xff]  ;;  %v37_v5 = vld [vmem:[#allocation2] sm:$0xff]  ;;  %vm47_vm1 = vcmask 261120   ;;  %vm137_vm3 = vcmask 7168   ;;  %v220_v19 = vmov 4294967295  }
  0x1b   :  { %153 = vmatpush3.msra.mxu0 %v41_v1  ;;  %v125_v7 = vshrl.u32 %v124_v6, 7  ;;  %v121_v8 = vld [vmem:[#allocation4 + $0x21] sm:$0x1]  ;;  %v145_v11 = vld [vmem:[#allocation4 + $0x20] ss:$0 sm:$0xff] }
  0x1c   :  { %154 = vmatprep.subr.mxu0 %v218_v0  ;;  %v123_v9 = vsub.f32 0.0, %v121_v8 }
  0x1d   :  { %155 = vmatpush3.msra.mxu0 %v40_v2  ;;  %v126_v10 = vsub.s32 0, %v125_v7 }
  0x1e   :  { %156 = vmatprep.subr.mxu0 %v218_v0 }
  0x1f   :  { %157 = vmatpush3.msra.mxu0 %v39_v3  ;;  %v127_v13 = vrot.slane %v121_v8, %v126_v10  ;;  %v131_v14 = vrot.slane %v123_v9, %v126_v10 }
  0x20   :  { %158 = vmatprep.subr.mxu0 %v218_v0 }
  0x21   :  { %159 = vmatpush3.msra.mxu0 %v38_v4 }
  0x22   :  { %161 = vmatmul.mubr.msk.f32.vlgmr.msra.gmra.mxu0 %vm47_vm1, %v37_v5 }
  0xe2   :  { %v117_v12 = vpop.f32.mrf.mxu0 }
  0xe3   :  { %v118_v15 = vadd.f32 %v145_v11, %v117_v12 }
  0xe4   :  { %v162_v16 = vpop.f32.mrf.mxu0 }
  0xe5   :  { %vm122_vm2 = vcmp.gt.f32.partialorder %v118_v15, 0.0 }
  0xe6   :  { %v132_v17 = vsel %vm122_vm2, %v127_v13, %v131_v14 }
  0xe7   :  { %133 = vadd.xlane.f32.xlu0 %v132_v17 }
 0x170   :  { %v134_v18 = vpop.xlane.xlu0 %133 }
 0x171   :  { %vm135_vm4 = vcmp.ge.f32.partialorder %v134_v18, 1.0 }
 0x172   :  { %v136_v20 = vsel %vm135_vm4, 1, %v220_v19 }
 0x173   :  { %138 = vst.msk [vmem:[%s247_s2] sm:$0xff] %vm137_vm3, %v136_v20 }
 0x174   :  { %143 = vsyncpa [#allocation3], 1 }
 0x175   :  { %144 = vsyncpa [#allocation5], 1 }

</bundles_post_ra>
